<compile_context>
chip_gen: v6e
topology: v6e:2x2x1
jax: 0.10.0
libtpu: 0.0.40
codegen_flags: <defaults>
</compile_context>

<pallas_src>
import jax
import jax.numpy as jnp
from jax.experimental import pallas as pl
from jax.experimental.pallas import tpu as pltpu

_LANE = 128
_SUBLANE = 8


def _vmem_capacity_bytes():
    """Physical VMEM of this TPU generation (fallback: 64 MiB = v7x floor)."""
    try:
        return int(pltpu.get_tpu_info().vmem_capacity_bytes)
    except Exception:
        return 64 * 1024 * 1024


def _round_down(x, m):
    return (x // m) * m


def _round_up(x, m):
    return ((x + m - 1) // m) * m


def _finish(e, s, out_dtype):
    # 1/s via EUP approximate reciprocal + one Newton-Raphson refinement
    # (full f32 precision on the tiny reduced tensor, keeps the big multiply
    # off the VALU divide path).
    r = pl.reciprocal(s, approx=True)
    r = r * (2.0 - s * r)
    return (e * r).astype(out_dtype)


def _softmax_rows_kernel(x_ref, o_ref):
    # Softmax along the last axis; softmax axis already (near-)lane-dense.
    x = x_ref[...].astype(jnp.float32)
    m = jnp.max(x, axis=-1, keepdims=True)
    e = jnp.exp(x - m)
    s = jnp.sum(e, axis=-1, keepdims=True)
    o_ref[...] = _finish(e, s, o_ref.dtype)


def _softmax_small_cols_kernel(x_ref, o_ref):
    # cols < 128: transpose the tile on-chip (XLU) so the flattened batch dim
    # sits on the 128 lanes (dense VPU/EUP), reduce along sublanes, transpose
    # back before the store.  No extra HBM passes.
    x = x_ref[...].astype(jnp.float32)          # (tile_r, cols)
    xt = jnp.transpose(x)                        # (cols, tile_r), lane-dense
    m = jnp.max(xt, axis=0, keepdims=True)
    e = jnp.exp(xt - m)
    s = jnp.sum(e, axis=0, keepdims=True)
    yt = _finish(e, s, jnp.float32)
    o_ref[...] = jnp.transpose(yt).astype(o_ref.dtype)


def _pick_tile_rows(rows, row_bytes, per_buffer_bytes, granule):
    """Rows per block: multiple of `granule` (or == rows), sized to the
    per-buffer budget; prefer >=2 grid steps (v7x megacore) when each block
    would still be >= ~1 MiB."""
    t = per_buffer_bytes // max(row_bytes, 1)
    t = max(granule, _round_down(t, granule))
    if t >= rows:
        t = rows
        half = _round_up(pl.cdiv(rows, 2), granule)
        if half < rows and half * row_bytes >= (1 << 20):
            t = half
    return t


def func_module_softmax(x):
    """FuncModule(softmax) forward: softmax along the last axis of x."""
    orig_shape = x.shape
    cols = orig_shape[-1]
    rows = 1
    for d in orig_shape[:-1]:
        rows *= d
    x2d = x.reshape(rows, cols)

    itemsize = jnp.dtype(x.dtype).itemsize
    n_elems = rows * cols
    cost = pl.CostEstimate(
        flops=5 * n_elems,
        transcendentals=n_elems,
        bytes_accessed=2 * n_elems * itemsize,
    )

    vmem_cap = _vmem_capacity_bytes()
    # Per-buffer block budget at the INPUT dtype: 8 MiB on 128 MiB parts
    # (v5e/v6e), 4 MiB on v7x's 64 MiB VMEM.  f32 temporaries are accounted
    # for separately in vmem_limit below.
    per_buffer = max(512 * 1024, min(8 * 1024 * 1024, vmem_cap // 16))

    row_bytes = cols * itemsize

    # Lane-dense on-chip-transpose path only when shapes are transpose-friendly
    # (multiples of the sublane granule); otherwise the row-major kernel is
    # still correct, just with partially-masked lanes.
    use_transpose = (cols < _LANE) and (cols % _SUBLANE == 0) and (rows % _SUBLANE == 0)
    if use_transpose:
        kernel = _softmax_small_cols_kernel
        granule = _LANE if rows >= _LANE else _SUBLANE
    else:
        kernel = _softmax_rows_kernel
        granule = _SUBLANE

    tile_r = _pick_tile_rows(rows, row_bytes, per_buffer, granule)
    grid = (pl.cdiv(rows, tile_r),)

    # Resident VMEM per step: double-buffered in+out blocks (input dtype) plus
    # in-kernel f32 temporaries; cap at ~3/4 of physical VMEM so a very wide
    # softmax row (tile_r floor of 8) still compiles on v5e/v7x scoped limits.
    blk_in = tile_r * cols * itemsize
    blk_f32 = tile_r * cols * 4
    vmem_need = 2 * 2 * blk_in + 6 * blk_f32 + (1 << 20)
    vmem_limit = int(min(max(vmem_need, 32 * 1024 * 1024), (vmem_cap * 3) // 4))
    # TODO(synk): rows wider than ~3/4 VMEM (huge vocab-style softmax) would
    # need an online / two-pass softmax tiled over the cols axis as well.

    cparams = pltpu.CompilerParams(
        dimension_semantics=("parallel",),
        vmem_limit_bytes=vmem_limit,
    )

    out2d = pl.pallas_call(
        kernel,
        out_shape=jax.ShapeDtypeStruct((rows, cols), x.dtype),
        grid_spec=pl.GridSpec(
            grid=grid,
            in_specs=[pl.BlockSpec((tile_r, cols), lambda i: (i, 0))],
            out_specs=pl.BlockSpec((tile_r, cols), lambda i: (i, 0)),
        ),
        compiler_params=cparams,
        cost_estimate=cost,
    )(x2d)
    return out2d.reshape(orig_shape)


if __name__ == "__main__":
    key = jax.random.PRNGKey(0)

    # Small NCHW-shaped input consistent with a conv-style tensor
    # (exercises the cols < 128 lane-dense on-chip-transpose path).
    x = jax.random.normal(key, (2, 4, 16, 16), dtype=jnp.float32)
    out = jax.block_until_ready(func_module_softmax(x))
    ref = jax.nn.softmax(x, axis=-1)
    assert jnp.allclose(out, ref, atol=1e-5, rtol=1e-5), "mismatch vs reference (small cols)"

    # Also exercise the wide-row (cols >= 128) path.
    x2 = jax.random.normal(jax.random.PRNGKey(1), (2, 8, 256), dtype=jnp.float32)
    out2 = jax.block_until_ready(func_module_softmax(x2))
    ref2 = jax.nn.softmax(x2, axis=-1)
    assert jnp.allclose(out2, ref2, atol=1e-5, rtol=1e-5), "mismatch vs reference (wide cols)"

    print("KERNEL_OK")
</pallas_src>

<mosaic_0001>
module attributes {stable_mosaic.version = 11 : i64} {
  func.func @_softmax_small_cols_kernel(%arg0: i32, %arg1: memref<128x16xf32, #tpu.memory_space<vmem>>, %arg2: memref<128x16xf32, #tpu.memory_space<vmem>>) attributes {dimension_semantics = [#tpu.dimension_semantics<parallel>], iteration_bounds = array<i64: 1>, scalar_prefetch = 0 : i64, scratch_operands = 0 : i64, tpu.core_type = #tpu.core_type<tc>, window_params = [{transform_indices = @transform_0, window_bounds = array<i64: 128, 16>}, {transform_indices = @transform_1, window_bounds = array<i64: 128, 16>}]} {
    %c0 = arith.constant 0 : index
    %c0_0 = arith.constant 0 : index
    %0 = vector.load %arg1[%c0, %c0_0] : memref<128x16xf32, #tpu.memory_space<vmem>>, vector<128x16xf32>
    %1 = tpu.transpose %0, [1, 0] : vector<128x16xf32> -> vector<16x128xf32>
    %cst = arith.constant dense<0xFF800000> : vector<128xf32>
    %2 = vector.multi_reduction <maximumf>, %1, %cst [0] : vector<16x128xf32> to vector<128xf32>
    %3 = vector.shape_cast %2 : vector<128xf32> to vector<1x128xf32>
    %4 = vector.broadcast %3 : vector<1x128xf32> to vector<16x128xf32>
    %5 = arith.subf %1, %4 : vector<16x128xf32>
    %6 = math.exp %5 : vector<16x128xf32>
    %cst_1 = arith.constant dense<0.000000e+00> : vector<128xf32>
    %7 = vector.multi_reduction <add>, %6, %cst_1 [0] : vector<16x128xf32> to vector<128xf32>
    %8 = vector.shape_cast %7 : vector<128xf32> to vector<1x128xf32>
    %9 = tpu.reciprocal %8 {approx = true} : vector<1x128xf32> -> vector<1x128xf32>
    %10 = arith.mulf %8, %9 : vector<1x128xf32>
    %cst_2 = arith.constant 2.000000e+00 : f32
    %11 = vector.broadcast %cst_2 : f32 to vector<1x128xf32>
    %12 = arith.subf %11, %10 : vector<1x128xf32>
    %13 = arith.mulf %9, %12 : vector<1x128xf32>
    %14 = vector.broadcast %13 : vector<1x128xf32> to vector<16x128xf32>
    %15 = arith.mulf %6, %14 : vector<16x128xf32>
    %16 = tpu.transpose %15, [1, 0] : vector<16x128xf32> -> vector<128x16xf32>
    %c0_3 = arith.constant 0 : index
    %c0_4 = arith.constant 0 : index
    %17 = vector.load %arg2[%c0_3, %c0_4] : memref<128x16xf32, #tpu.memory_space<vmem>>, vector<128x16xf32>
    tpu.vector_store %arg2[%c0_3, %c0_4], %16 {strides = array<i32>} : memref<128x16xf32, #tpu.memory_space<vmem>>, vector<128x16xf32>,
    return
  }
  func.func @transform_0(%arg0: i32) -> (i32, i32) {
    %c0_i32 = arith.constant 0 : i32
    %c0_i32_0 = arith.constant 0 : i32
    return %arg0, %c0_i32 : i32, i32
  }
  func.func @transform_1(%arg0: i32) -> (i32, i32) {
    %c0_i32 = arith.constant 0 : i32
    %c0_i32_0 = arith.constant 0 : i32
    return %arg0, %c0_i32 : i32, i32
  }
}

</mosaic_0001>

<bundles_post_ra>
// kernel: tpu_custom_call.1
= control target key start
LH: loop header
LB: loop body
LE: loop exit
PB: predicated region body
PF: predicated region fallthrough
CT: control target
= control target key end

     0   :  { %vm114_vm0 = vcmask 130048   ;;  %s264_s0 = inlined_call_operand.vmem [shape: f32[128,16], index: 0, kind: input, shape index: {}]   ;;  %s265_s1 = inlined_call_operand.vmem [shape: f32[128,16], index: 1, kind: output, shape index: {}]  }
   0x1   :  { %v8_v0 = vld [vmem:[%s264_s0] sm:$0xff]  ;;  %v9_v1 = vld [vmem:[%s264_s0 + $0x8] sm:$0xff]  ;;  %v10_v2 = vld [vmem:[%s264_s0 + $0x10] sm:$0xff] }
   0x2   :  { %24 = vxpose.xlu0.b32.start [1/16] (narrow) %v8_v0, 16  ;;  %v11_v3 = vld [vmem:[%s264_s0 + $0x18] sm:$0xff]  ;;  %v12_v4 = vld [vmem:[%s264_s0 + $0x20] sm:$0xff]  ;;  %v13_v5 = vld [vmem:[%s264_s0 + $0x28] sm:$0xff] }
   0x3   :  { %v14_v6 = vld [vmem:[%s264_s0 + $0x30] sm:$0xff]  ;;  %v15_v7 = vld [vmem:[%s264_s0 + $0x38] sm:$0xff]  ;;  %v16_v8 = vld [vmem:[%s264_s0 + $0x40] sm:$0xff] }
   0x4   :  { %v17_v9 = vld [vmem:[%s264_s0 + $0x48] sm:$0xff]  ;;  %v18_v10 = vld [vmem:[%s264_s0 + $0x50] sm:$0xff]  ;;  %v19_v11 = vld [vmem:[%s264_s0 + $0x58] sm:$0xff] }
   0x5   :  { %v20_v12 = vld [vmem:[%s264_s0 + $0x60] sm:$0xff]  ;;  %v21_v13 = vld [vmem:[%s264_s0 + $0x68] sm:$0xff]  ;;  %v22_v14 = vld [vmem:[%s264_s0 + $0x70] sm:$0xff] }
   0x6   :  { %25 = vxpose.xlu0.b32.cont [2/16] (narrow) %v9_v1, 16  ;;  %v23_v15 = vld [vmem:[%s264_s0 + $0x78] sm:$0xff] }
   0xa   :  { %26 = vxpose.xlu0.b32.cont [3/16] (narrow) %v10_v2, 16 }
   0xe   :  { %27 = vxpose.xlu0.b32.cont [4/16] (narrow) %v11_v3, 16 }
  0x12   :  { %28 = vxpose.xlu0.b32.cont [5/16] (narrow) %v12_v4, 16 }
  0x16   :  { %29 = vxpose.xlu0.b32.cont [6/16] (narrow) %v13_v5, 16 }
  0x1a   :  { %30 = vxpose.xlu0.b32.cont [7/16] (narrow) %v14_v6, 16 }
  0x1e   :  { %31 = vxpose.xlu0.b32.cont [8/16] (narrow) %v15_v7, 16 }
  0x22   :  { %32 = vxpose.xlu0.b32.cont [9/16] (narrow) %v16_v8, 16 }
  0x26   :  { %33 = vxpose.xlu0.b32.cont [10/16] (narrow) %v17_v9, 16 }
  0x2a   :  { %34 = vxpose.xlu0.b32.cont [11/16] (narrow) %v18_v10, 16 }
  0x2e   :  { %35 = vxpose.xlu0.b32.cont [12/16] (narrow) %v19_v11, 16 }
  0x32   :  { %36 = vxpose.xlu0.b32.cont [13/16] (narrow) %v20_v12, 16 }
  0x36   :  { %37 = vxpose.xlu0.b32.cont [14/16] (narrow) %v21_v13, 16 }
  0x3a   :  { %38 = vxpose.xlu0.b32.cont [15/16] (narrow) %v22_v14, 16 }
  0x3e   :  { %39 = vxpose.xlu0.b32.end [16/16] (narrow) %v23_v15, 16 }
  0x7e   :  { %v40_v16 = vpop.trf.xlu0 }
  0x82   :  { %v41_v17 = vpop.trf.xlu0 }
  0x83   :  { %v56_v18 = vmax.f32 %v40_v16, %v41_v17 }
  0x85   :  { %v57_v19 = vrot.slane %v56_v18, 4 }
  0x87   :  { %v58_v20 = vmax.f32 %v56_v18, %v57_v19 }
  0x89   :  { %v59_v21 = vrot.slane %v58_v20, 2 }
  0x8b   :  { %v60_v22 = vmax.f32 %v58_v20, %v59_v21 }
  0x8d   :  { %v61_v23 = vrot.slane %v60_v22, 1 }
  0x8f   :  { %v62_v24 = vmax.f32 %v60_v22, %v61_v23 }
  0x91   :  { %v63_v25 = vsub.f32 %v40_v16, %v62_v24  ;;  %v64_v26 = vsub.f32 %v41_v17, %v62_v24 }
  0x93   :  { %v65_v27 = vmul.f32 1.442695, %v63_v25  ;;  %v67_v28 = vmul.f32 1.442695, %v64_v26 }
  0x95   :  { %136 = vpow2.f32 %v65_v27 }
  0x96   :  { %138 = vpow2.f32 %v67_v28 }
  0xa2   :  { %v137_v29 = vpop.eup %136 }
  0xa3   :  { %v139_v30 = vpop.eup %138 }
  0xa4   :  { %v69_v31 = vadd.f32 %v139_v30, %v137_v29 }
  0xa6   :  { %v70_v32 = vrot.slane %v69_v31, 4 }
  0xa8   :  { %v71_v33 = vadd.f32 %v70_v32, %v69_v31 }
  0xaa   :  { %v72_v34 = vrot.slane %v71_v33, 2 }
  0xac   :  { %v73_v35 = vadd.f32 %v72_v34, %v71_v33 }
  0xae   :  { %v74_v36 = vrot.slane %v73_v35, 1 }
  0xb0   :  { %v75_v37 = vadd.f32 %v74_v36, %v73_v35 }
  0xb2   :  { %140 = vrcp.f32 %v75_v37 }
  0xbf   :  { %v141_v38 = vpop.eup %140 }
  0xc0   :  { %v77_v39 = vmul.f32 %v141_v38, %v75_v37 }
  0xc2   :  { %v78_v40 = vsub.f32 2.0, %v77_v39 }
  0xc4   :  { %v79_v41 = vmul.f32 %v141_v38, %v78_v40 }
  0xc6   :  { %v80_v42 = vmul.f32 %v137_v29, %v79_v41  ;;  %v81_v43 = vmul.f32 %v139_v30, %v79_v41 }
  0xc8   :  { %82 = vxpose.xlu1.b32.start [1/2] (short) %v80_v42, 128 }
  0xcc   :  { %83 = vxpose.xlu1.b32.end [2/2] (short) %v81_v43, 128 }
 0x144   :  { %v98_v44 = vpop.trf.xlu1 }
 0x145   :  { %115 = vst.msk [vmem:[%s265_s1] sm:$0xff] %vm114_vm0, %v98_v44 }
 0x148   :  { %v99_v45 = vpop.trf.xlu1 }
 0x149   :  { %116 = vst.msk [vmem:[%s265_s1 + $0x8] sm:$0xff] %vm114_vm0, %v99_v45 }
 0x14c   :  { %v100_v46 = vpop.trf.xlu1 }
 0x14d   :  { %117 = vst.msk [vmem:[%s265_s1 + $0x10] sm:$0xff] %vm114_vm0, %v100_v46 }
 0x150   :  { %v101_v47 = vpop.trf.xlu1 }
 0x151   :  { %118 = vst.msk [vmem:[%s265_s1 + $0x18] sm:$0xff] %vm114_vm0, %v101_v47 }
 0x154   :  { %v102_v48 = vpop.trf.xlu1 }
 0x155   :  { %119 = vst.msk [vmem:[%s265_s1 + $0x20] sm:$0xff] %vm114_vm0, %v102_v48 }
 0x158   :  { %v103_v49 = vpop.trf.xlu1 }
 0x159   :  { %120 = vst.msk [vmem:[%s265_s1 + $0x28] sm:$0xff] %vm114_vm0, %v103_v49 }
 0x15c   :  { %v104_v50 = vpop.trf.xlu1 }
 0x15d   :  { %121 = vst.msk [vmem:[%s265_s1 + $0x30] sm:$0xff] %vm114_vm0, %v104_v50 }
 0x160   :  { %v105_v51 = vpop.trf.xlu1 }
 0x161   :  { %122 = vst.msk [vmem:[%s265_s1 + $0x38] sm:$0xff] %vm114_vm0, %v105_v51 }
 0x164   :  { %v106_v52 = vpop.trf.xlu1 }
 0x165   :  { %123 = vst.msk [vmem:[%s265_s1 + $0x40] sm:$0xff] %vm114_vm0, %v106_v52 }
 0x168   :  { %v107_v53 = vpop.trf.xlu1 }
 0x169   :  { %124 = vst.msk [vmem:[%s265_s1 + $0x48] sm:$0xff] %vm114_vm0, %v107_v53 }
 0x16c   :  { %v108_v54 = vpop.trf.xlu1 }
 0x16d   :  { %125 = vst.msk [vmem:[%s265_s1 + $0x50] sm:$0xff] %vm114_vm0, %v108_v54 }
 0x170   :  { %v109_v55 = vpop.trf.xlu1 }
 0x171   :  { %126 = vst.msk [vmem:[%s265_s1 + $0x58] sm:$0xff] %vm114_vm0, %v109_v55 }
 0x174   :  { %v110_v56 = vpop.trf.xlu1 }
 0x175   :  { %127 = vst.msk [vmem:[%s265_s1 + $0x60] sm:$0xff] %vm114_vm0, %v110_v56 }
 0x178   :  { %v111_v57 = vpop.trf.xlu1 }
 0x179   :  { %128 = vst.msk [vmem:[%s265_s1 + $0x68] sm:$0xff] %vm114_vm0, %v111_v57 }
 0x17c   :  { %v112_v58 = vpop.trf.xlu1 }
 0x17d   :  { %129 = vst.msk [vmem:[%s265_s1 + $0x70] sm:$0xff] %vm114_vm0, %v112_v58 }
 0x180   :  { %v113_v59 = vpop.trf.xlu1 }
 0x181   :  { %130 = vst.msk [vmem:[%s265_s1 + $0x78] sm:$0xff] %vm114_vm0, %v113_v59 }

</bundles_post_ra>
